<compile_context>
chip_gen: v7x
topology: tpu7x:2x2x1
jax: 0.10.0
libtpu: 0.0.40
codegen_flags: <defaults>
</compile_context>

<pallas_src>
import functools

import numpy as np
import jax
import jax.numpy as jnp
from jax.experimental import pallas as pl
from jax.experimental.pallas import tpu as pltpu


def _round_up(x, m):
    return ((x + m - 1) // m) * m


def _vmem_budget_bytes():
    """~0.75 of per-core VMEM capacity (works for v7x's 64 MiB and 128 MiB parts)."""
    cap = 128 << 20
    try:
        info = pltpu.get_tpu_info()
        cap = int(getattr(info, "vmem_capacity_bytes", cap) or cap)
    except Exception:
        pass
    return (cap // 4) * 3


def _normalize_kernel(x_ref, xn_ref):
    """xn = x * rsqrt(max(||x||^2, 1e-24))  ==  F.normalize(x, eps=1e-12)."""
    x = x_ref[...].astype(jnp.float32)
    inv = jax.lax.rsqrt(jnp.maximum(jnp.sum(x * x, axis=1, keepdims=True), 1e-24))
    xn_ref[...] = (x * inv).astype(xn_ref.dtype)


def _similarity_kernel(ti_ref, tj_ref, xl_ref, xr_ref, sim_ref):
    """One upper-triangle tile of xn @ xn.T (operands already normalized)."""
    del ti_ref, tj_ref  # only used by the index_maps
    # TODO(synk): verify with pl.lower_as_mlir that the ((1,),(1,)) contraction
    # (A @ B^T) does not emit a per-tile XLU transpose; if it does, pre-transpose
    # xn once to (D, Np) in HBM and contract ((1,),(0,)) instead.
    sim_ref[...] = jax.lax.dot_general(
        xl_ref[...], xr_ref[...],
        dimension_numbers=(((1,), (1,)), ((), ())),
        preferred_element_type=jnp.float32,
    ).astype(sim_ref.dtype)


def _build_output_kernel(s, sp_ref, snrow_ref, out_ref):
    """out tile = s * [sp | sn-broadcast].

    sp_ref   : (tp, 1)   positive-pair similarities for these rows
    snrow_ref: (1, tw)   this tile's slice of [dummy-col0 | sn]
    out_ref  : (tp, tw)
    Only the column-0 grid tile needs the sp column; other tiles are a pure
    lane-dense broadcast store (no iota / compare / select).
    """
    jw = pl.program_id(1)
    tp, tw = out_ref.shape
    sn_b = jnp.broadcast_to(snrow_ref[...], (tp, tw))

    @pl.when(jw == 0)
    def _():
        col = jax.lax.broadcasted_iota(jnp.int32, (tp, tw), 1)
        sp_b = jnp.broadcast_to(sp_ref[...], (tp, tw))
        out_ref[...] = s * jnp.where(col == 0, sp_b, sn_b)

    @pl.when(jw != 0)
    def _():
        out_ref[...] = s * sn_b


def similarity_based_npair_loss(x, labels, s=16.0, *, use_bf16_matmul=True, tile=None):
    N, D = x.shape
    matmul_dtype = jnp.bfloat16 if use_bf16_matmul else jnp.float32
    sim_dtype = matmul_dtype           # bf16 sim halves the N^2 writeback; f32 path stays exact
    itm = jnp.dtype(matmul_dtype).itemsize
    sim_itm = jnp.dtype(sim_dtype).itemsize
    vmem_budget = _vmem_budget_bytes()

    # Pick the largest tile whose double-buffered per-step footprint fits the budget.
    if tile is None:
        tile = 128
        for cand in (512, 256, 128):
            need = 2 * (2 * cand * D * itm + cand * cand * sim_itm)
            if need <= vmem_budget - (8 << 20):
                tile = cand
                break
    tile_n = min(tile, _round_up(max(N, 1), 128))
    Np = _round_up(N, tile_n)
    grid_n = Np // tile_n

    # ---------------- hot path 0: normalize once, store xn in matmul dtype ----------------
    x_p = x if Np == N else jnp.pad(x, ((0, Np - N), (0, 0)))   # zero rows normalize to zero
    xn = pl.pallas_call(
        _normalize_kernel,
        out_shape=jax.ShapeDtypeStruct((Np, D), matmul_dtype),
        grid=(grid_n,),
        in_specs=[pl.BlockSpec((tile_n, D), lambda i: (i, 0))],
        out_specs=pl.BlockSpec((tile_n, D), lambda i: (i, 0)),
        compiler_params=pltpu.CompilerParams(dimension_semantics=("parallel",)),
    )(x_p)

    # ---------------- hot path 1: upper-triangle tiles of xn @ xn.T on the MXU ----------------
    # Flat 1D grid over the grid_n*(grid_n+1)/2 tiles with j >= i; block indices
    # come from scalar-prefetched SMEM tables, so lower-triangle tiles cost
    # nothing. Unvisited lower-triangle blocks of `sim` stay uninitialized and
    # are never read (pairs are strictly upper-triangular).
    ti_host, tj_host = np.triu_indices(grid_n)
    n_tiles = int(ti_host.size)
    ti_arr = jnp.asarray(ti_host, jnp.int32)
    tj_arr = jnp.asarray(tj_host, jnp.int32)

    blk_bytes = 2 * (2 * tile_n * D * itm + tile_n * tile_n * sim_itm) + (8 << 20)
    vmem_limit = int(min(max(blk_bytes, 32 << 20), vmem_budget))
    cost = pl.CostEstimate(
        flops=int(2 * n_tiles * tile_n * tile_n * D),
        transcendentals=0,
        bytes_accessed=int(n_tiles * (2 * tile_n * D * itm + tile_n * tile_n * sim_itm)),
    )

    sim = pl.pallas_call(
        _similarity_kernel,
        out_shape=jax.ShapeDtypeStruct((Np, Np), sim_dtype),
        grid_spec=pltpu.PrefetchScalarGridSpec(
            num_scalar_prefetch=2,
            grid=(n_tiles,),
            in_specs=[
                pl.BlockSpec((tile_n, D), lambda t, ti, tj: (ti[t], 0)),
                pl.BlockSpec((tile_n, D), lambda t, ti, tj: (tj[t], 0)),
            ],
            out_specs=pl.BlockSpec((tile_n, tile_n), lambda t, ti, tj: (ti[t], tj[t])),
        ),
        compiler_params=pltpu.CompilerParams(
            # Each grid step writes a distinct output block, so this axis is
            # safely flippable to "parallel" on multi-TC parts (v7x) after a
            # bundle-dump check; kept "arbitrary" for maximum portability.
            dimension_semantics=("arbitrary",),
            vmem_limit_bytes=vmem_limit,
        ),
        cost_estimate=cost,
    )(ti_arr, tj_arr, xn, xn)

    # ---------------- glue: pair selection (data-dependent output shape) ----------------
    # Boolean-mask selection has data-dependent P/Q, so pair indices are built
    # from concrete labels on the host (hard constraint: this function cannot
    # be jit-wrapped with traced labels).
    lab = np.asarray(labels)
    eq = lab[:, None] == lab[None, :]
    triu = np.triu(np.ones((N, N), dtype=bool), k=1)
    pos_r, pos_c = np.nonzero(eq & triu)
    neg_r, neg_c = np.nonzero((~eq) & triu)
    P, Q = int(pos_r.size), int(neg_r.size)
    assert P > 0 and Q > 0, "need at least one positive and one negative pair"

    # 2D (row, col) int32 gather of only P+Q scalars (no flat-index overflow).
    sp = sim[jnp.asarray(pos_r, jnp.int32), jnp.asarray(pos_c, jnp.int32)].astype(jnp.float32)
    sn = sim[jnp.asarray(neg_r, jnp.int32), jnp.asarray(neg_c, jnp.int32)].astype(jnp.float32)

    # ---------------- hot path 2: build the exact (P, 1+Q) output (no slice copy) ----------------
    # TODO(synk): columns 1..Q are rank-1 (same s*sn row repeated); a fused
    # downstream softmax-CE would avoid materializing O(P*Q) bytes, but that
    # changes the caller contract, so the full matrix is built here.
    W = 1 + Q
    tp = P if P <= 512 else 256      # full-dim block, or 8-aligned tile with masked ragged edge
    tw = W if W <= 2048 else 1024    # full-dim block, or lane-dense 128-multiple tile
    sp_col = sp.reshape(P, 1)
    sn_row = jnp.concatenate([jnp.zeros((1, 1), jnp.float32), sn.reshape(1, Q)], axis=1)  # (1, W)

    out = pl.pallas_call(
        functools.partial(_build_output_kernel, float(s)),
        out_shape=jax.ShapeDtypeStruct((P, W), jnp.float32),
        grid=(pl.cdiv(P, tp), pl.cdiv(W, tw)),
        in_specs=[
            pl.BlockSpec((tp, 1), lambda ip, jw: (ip, 0)),
            pl.BlockSpec((1, tw), lambda ip, jw: (0, jw)),
        ],
        out_specs=pl.BlockSpec((tp, tw), lambda ip, jw: (ip, jw)),
        compiler_params=pltpu.CompilerParams(
            dimension_semantics=("parallel", "parallel")),
    )(sp_col, sn_row)

    # TODO(synk): torch returns int64 (.long()) labels; using TPU-native int32.
    re_labels = jnp.zeros((P,), dtype=jnp.int32)
    return out, re_labels


def _reference(x, labels, s=16.0):
    """Plain numpy/JAX reference for correctness checking."""
    xn = x / jnp.maximum(jnp.linalg.norm(x, axis=1, keepdims=True), 1e-12)
    sim = np.asarray(xn @ xn.T)
    lab = np.asarray(labels)
    N = lab.shape[0]
    eq = lab[:, None] == lab[None, :]
    triu = np.triu(np.ones((N, N), dtype=bool), k=1)
    pr, pc = np.nonzero(eq & triu)
    nr, nc = np.nonzero((~eq) & triu)
    sp = sim[pr, pc][:, None]
    sn = sim[nr, nc][None, :]
    out = s * np.concatenate([sp, np.ones_like(sp) * sn], axis=1)
    return out


if __name__ == "__main__":
    key = jax.random.PRNGKey(0)
    N, D = 8, 32
    x = jax.random.normal(key, (N, D), dtype=jnp.float32)
    labels = jnp.array([0, 0, 1, 1, 2, 2, 3, 3], dtype=jnp.int32)

    ref = _reference(x, labels, s=16.0)

    # Exact f32 path (f32 operands, f32 sim) -- tight tolerance.
    out_f32, re_labels = similarity_based_npair_loss(x, labels, s=16.0, use_bf16_matmul=False)
    out_f32 = jax.block_until_ready(out_f32)
    re_labels = jax.block_until_ready(re_labels)
    assert out_f32.shape == ref.shape, (out_f32.shape, ref.shape)
    assert re_labels.shape == (ref.shape[0],)
    assert int(jnp.sum(jnp.abs(re_labels))) == 0
    np.testing.assert_allclose(np.asarray(out_f32), ref, rtol=1e-4, atol=1e-4)

    # Default path: bf16 MXU operands + bf16 sim (f32 accumulation) -- relaxed tolerance.
    out_bf16, _ = similarity_based_npair_loss(x, labels, s=16.0)
    out_bf16 = jax.block_until_ready(out_bf16)
    np.testing.assert_allclose(np.asarray(out_bf16), ref, rtol=5e-2, atol=5e-1)

    print("KERNEL_OK")
</pallas_src>

<mosaic_0001>
module attributes {stable_mosaic.version = 11 : i64} {
  func.func @_normalize_kernel(%arg0: i32, %arg1: memref<128x32xf32, #tpu.memory_space<vmem>>, %arg2: memref<128x32xf32, #tpu.memory_space<vmem>>) attributes {dimension_semantics = [#tpu.dimension_semantics<parallel>], iteration_bounds = array<i64: 1>, scalar_prefetch = 0 : i64, scratch_operands = 0 : i64, tpu.core_type = #tpu.core_type<tc>, window_params = [{transform_indices = @transform_0, window_bounds = array<i64: 128, 32>}, {transform_indices = @transform_1, window_bounds = array<i64: 128, 32>}]} {
    %c0 = arith.constant 0 : index
    %c0_0 = arith.constant 0 : index
    %0 = vector.load %arg1[%c0, %c0_0] : memref<128x32xf32, #tpu.memory_space<vmem>>, vector<128x32xf32>
    %1 = arith.mulf %0, %0 : vector<128x32xf32>
    %cst = arith.constant dense<0.000000e+00> : vector<128xf32>
    %2 = vector.multi_reduction <add>, %1, %cst [1] : vector<128x32xf32> to vector<128xf32>
    %3 = vector.shape_cast %2 : vector<128xf32> to vector<128x1xf32>
    %cst_1 = arith.constant 1.000000e-24 : f32
    %4 = vector.broadcast %cst_1 : f32 to vector<128x1xf32>
    %5 = arith.maximumf %3, %4 : vector<128x1xf32>
    %6 = math.rsqrt %5 : vector<128x1xf32>
    %7 = vector.broadcast %6 : vector<128x1xf32> to vector<128x32xf32>
    %8 = arith.mulf %0, %7 : vector<128x32xf32>
    %c0_2 = arith.constant 0 : index
    %c0_3 = arith.constant 0 : index
    %9 = vector.load %arg2[%c0_2, %c0_3] : memref<128x32xf32, #tpu.memory_space<vmem>>, vector<128x32xf32>
    tpu.vector_store %arg2[%c0_2, %c0_3], %8 {strides = array<i32>} : memref<128x32xf32, #tpu.memory_space<vmem>>, vector<128x32xf32>,
    return
  }
  func.func @transform_0(%arg0: i32) -> (i32, i32) {
    %c0_i32 = arith.constant 0 : i32
    %c0_i32_0 = arith.constant 0 : i32
    return %arg0, %c0_i32 : i32, i32
  }
  func.func @transform_1(%arg0: i32) -> (i32, i32) {
    %c0_i32 = arith.constant 0 : i32
    %c0_i32_0 = arith.constant 0 : i32
    return %arg0, %c0_i32 : i32, i32
  }
}

</mosaic_0001>

<bundles_post_ra>
// kernel: tpu_custom_call.1
= control target key start
LH: loop header
LB: loop body
LE: loop exit
PB: predicated region body
PF: predicated region fallthrough
CT: control target
= control target key end

     0   :  { %vm40_vm0 = vcmask 261120   ;;  %s407_s0 = inlined_call_operand.vmem [shape: f32[128,32], index: 0, kind: input, shape index: {}]   ;;  %s408_s1 = inlined_call_operand.vmem [shape: f32[128,32], index: 1, kind: output, shape index: {}]  }
   0x1   :  { %v202_v0 = vld [vmem:[%s407_s0 + $0x10] sm:$0xff]  ;;  %v207_v1 = vld [vmem:[%s407_s0] sm:$0xff]  ;;  %v212_v2 = vld [vmem:[%s407_s0 + $0x18] sm:$0xff] }
   0x2   :  { %v26_v3 = vmul.f32 %v202_v0, %v202_v0  ;;  %v24_v4 = vmul.f32 %v207_v1, %v207_v1  ;;  %v27_v5 = vmul.f32 %v212_v2, %v212_v2  ;;  %v223_v6 = vld [vmem:[%s407_s0 + $0x8] sm:$0xff]  ;;  %v235_v9 = vld [vmem:[%s407_s0 + $0x20] sm:$0xff]  ;;  %v248_v16 = vld [vmem:[%s407_s0 + $0x38] sm:$0xff] }
   0x3   :  { %v25_v7 = vmul.f32 %v223_v6, %v223_v6  ;;  %v230_v8 = vld [vmem:[%s407_s0 + $0x28] sm:$0xff]  ;;  %v28_v15 = vmul.f32 %v235_v9, %v235_v9  ;;  %v253_v17 = vld [vmem:[%s407_s0 + $0x30] sm:$0xff]  ;;  %v31_v20 = vmul.f32 %v248_v16, %v248_v16  ;;  %v269_v23 = vld [vmem:[%s407_s0 + $0x40] sm:$0xff] }
   0x4   :  { %v47_v10 = vsel %vm40_vm0, %v26_v3, 0.0  ;;  %v41_v11 = vsel %vm40_vm0, %v24_v4, 0.0  ;;  %v50_v12 = vsel %vm40_vm0, %v27_v5, 0.0  ;;  %v29_v14 = vmul.f32 %v230_v8, %v230_v8  ;;  %v264_v22 = vld [vmem:[%s407_s0 + $0x48] sm:$0xff]  ;;  %v280_v28 = vld [vmem:[%s407_s0 + $0x58] sm:$0xff]  ;;  %v285_v29 = vld [vmem:[%s407_s0 + $0x50] sm:$0xff] }
   0x5   :  { %48 = vadd.xlane.f32.xlu1 %v47_v10  ;;  %42 = vadd.xlane.f32.xlu0 %v41_v11  ;;  %v44_v13 = vsel %vm40_vm0, %v25_v7, 0.0  ;;  %v53_v19 = vsel %vm40_vm0, %v28_v15, 0.0  ;;  %v30_v21 = vmul.f32 %v253_v17, %v253_v17  ;;  %v62_v24 = vsel %vm40_vm0, %v31_v20, 0.0  ;;  %v296_v34 = vld [vmem:[%s407_s0 + $0x68] sm:$0xff]  ;;  %v301_v35 = vld [vmem:[%s407_s0 + $0x60] sm:$0xff]  ;;  %v312_v40 = vld [vmem:[%s407_s0 + $0x78] sm:$0xff] }
   0x6   :  { %v56_v18 = vsel %vm40_vm0, %v29_v14, 0.0  ;;  %v33_v26 = vmul.f32 %v264_v22, %v264_v22  ;;  %v32_v27 = vmul.f32 %v269_v23, %v269_v23  ;;  %v35_v32 = vmul.f32 %v280_v28, %v280_v28  ;;  %v317_v41 = vld [vmem:[%s407_s0 + $0x70] sm:$0xff] }
   0x7   :  { %v59_v25 = vsel %vm40_vm0, %v30_v21, 0.0  ;;  %v34_v33 = vmul.f32 %v285_v29, %v285_v29  ;;  %v37_v38 = vmul.f32 %v296_v34, %v296_v34  ;;  %v36_v39 = vmul.f32 %v301_v35, %v301_v35 }
   0x8   :  { %v68_v30 = vsel %vm40_vm0, %v33_v26, 0.0  ;;  %v65_v31 = vsel %vm40_vm0, %v32_v27, 0.0  ;;  %v74_v36 = vsel %vm40_vm0, %v35_v32, 0.0  ;;  %v39_v44 = vmul.f32 %v312_v40, %v312_v40 }
   0x9   :  { %51 = vadd.xlane.f32.xlu1 %v50_v12  ;;  %45 = vadd.xlane.f32.xlu0 %v44_v13  ;;  %v71_v37 = vsel %vm40_vm0, %v34_v33, 0.0  ;;  %v80_v42 = vsel %vm40_vm0, %v37_v38, 0.0  ;;  %v77_v43 = vsel %vm40_vm0, %v36_v39, 0.0  ;;  %v38_v45 = vmul.f32 %v317_v41, %v317_v41 }
   0xa   :  { %v86_v46 = vsel %vm40_vm0, %v39_v44, 0.0 }
   0xb   :  { %v83_v47 = vsel %vm40_vm0, %v38_v45, 0.0 }
   0xd   :  { %57 = vadd.xlane.f32.xlu1 %v56_v18  ;;  %54 = vadd.xlane.f32.xlu0 %v53_v19 }
  0x11   :  { %63 = vadd.xlane.f32.xlu1 %v62_v24  ;;  %60 = vadd.xlane.f32.xlu0 %v59_v25 }
  0x15   :  { %69 = vadd.xlane.f32.xlu1 %v68_v30  ;;  %66 = vadd.xlane.f32.xlu0 %v65_v31 }
  0x19   :  { %75 = vadd.xlane.f32.xlu1 %v74_v36  ;;  %72 = vadd.xlane.f32.xlu0 %v71_v37 }
  0x1d   :  { %81 = vadd.xlane.f32.xlu1 %v80_v42  ;;  %78 = vadd.xlane.f32.xlu0 %v77_v43 }
  0x21   :  { %87 = vadd.xlane.f32.xlu1 %v86_v46  ;;  %84 = vadd.xlane.f32.xlu0 %v83_v47 }
  0x92   :  { %v49_v48 = vpop.xlane.xlu1 %48  ;;  %v43_v49 = vpop.xlane.xlu0 %42 }
  0x93   :  { %v91_v50 = vmax.f32 %v49_v48, 1e-24  ;;  %v89_v51 = vmax.f32 %v43_v49, 1e-24 }
  0x95   :  { %157 = vrsqrt.f32 %v91_v50 }
  0x96   :  { %159 = vrsqrt.f32 %v89_v51  ;;  %v52_v52 = vpop.xlane.xlu1 %51  ;;  %v46_v53 = vpop.xlane.xlu0 %45 }
  0x97   :  { %v92_v54 = vmax.f32 %v52_v52, 1e-24  ;;  %v90_v55 = vmax.f32 %v46_v53, 1e-24 }
  0x99   :  { %161 = vrsqrt.f32 %v92_v54 }
  0x9a   :  { %163 = vrsqrt.f32 %v90_v55  ;;  %v58_v56 = vpop.xlane.xlu1 %57  ;;  %v55_v57 = vpop.xlane.xlu0 %54 }
  0x9b   :  { %v94_v58 = vmax.f32 %v58_v56, 1e-24  ;;  %v93_v59 = vmax.f32 %v55_v57, 1e-24 }
  0x9d   :  { %165 = vrsqrt.f32 %v94_v58 }
  0x9e   :  { %167 = vrsqrt.f32 %v93_v59  ;;  %v64_v60 = vpop.xlane.xlu1 %63  ;;  %v61_v61 = vpop.xlane.xlu0 %60 }
  0x9f   :  { %v158_v62 = vpop.eup %157  ;;  %v96_v63 = vmax.f32 %v64_v60, 1e-24  ;;  %v95_v3 = vmax.f32 %v61_v61, 1e-24 }
  0xa0   :  { %v160_v4 = vpop.eup %159  ;;  %v123_v5 = vmul.f32 %v158_v62, %v202_v0 }
  0xa1   :  { %v121_v7 = vmul.f32 %v160_v4, %v207_v1  ;;  %169 = vrsqrt.f32 %v96_v63 }
  0xa2   :  { %139 = vst.msk [vmem:[%s408_s1 + $0x10] sm:$0xff] %vm40_vm0, %v123_v5  ;;  %171 = vrsqrt.f32 %v95_v3  ;;  %v70_v10 = vpop.xlane.xlu1 %69  ;;  %v67_v11 = vpop.xlane.xlu0 %66 }
  0xa3   :  { %v162_v12 = vpop.eup %161  ;;  %137 = vst.msk [vmem:[%s408_s1] sm:$0xff] %vm40_vm0, %v121_v7  ;;  %v98_v13 = vmax.f32 %v70_v10, 1e-24  ;;  %v97_v14 = vmax.f32 %v67_v11, 1e-24 }
  0xa4   :  { %v164_v0 = vpop.eup %163  ;;  %v124_v1 = vmul.f32 %v162_v12, %v212_v2 }
  0xa5   :  { %v122_v15 = vmul.f32 %v164_v0, %v223_v6  ;;  %173 = vrsqrt.f32 %v98_v13 }
  0xa6   :  { %140 = vst.msk [vmem:[%s408_s1 + $0x18] sm:$0xff] %vm40_vm0, %v124_v1  ;;  %175 = vrsqrt.f32 %v97_v14  ;;  %v76_v18 = vpop.xlane.xlu1 %75  ;;  %v73_v19 = vpop.xlane.xlu0 %72 }
  0xa7   :  { %v166_v20 = vpop.eup %165  ;;  %138 = vst.msk [vmem:[%s408_s1 + $0x8] sm:$0xff] %vm40_vm0, %v122_v15  ;;  %v100_v21 = vmax.f32 %v76_v18, 1e-24  ;;  %v99_v24 = vmax.f32 %v73_v19, 1e-24 }
  0xa8   :  { %v168_v2 = vpop.eup %167  ;;  %v126_v6 = vmul.f32 %v166_v20, %v230_v8 }
  0xa9   :  { %v125_v25 = vmul.f32 %v168_v2, %v235_v9  ;;  %177 = vrsqrt.f32 %v100_v21 }
  0xaa   :  { %142 = vst.msk [vmem:[%s408_s1 + $0x28] sm:$0xff] %vm40_vm0, %v126_v6  ;;  %179 = vrsqrt.f32 %v99_v24  ;;  %v82_v26 = vpop.xlane.xlu1 %81  ;;  %v79_v27 = vpop.xlane.xlu0 %78 }
  0xab   :  { %v170_v30 = vpop.eup %169  ;;  %141 = vst.msk [vmem:[%s408_s1 + $0x20] sm:$0xff] %vm40_vm0, %v125_v25  ;;  %v102_v31 = vmax.f32 %v82_v26, 1e-24  ;;  %v101_v32 = vmax.f32 %v79_v27, 1e-24 }
  0xac   :  { %v172_v8 = vpop.eup %171  ;;  %v128_v9 = vmul.f32 %v170_v30, %v248_v16 }
  0xad   :  { %v127_v33 = vmul.f32 %v172_v8, %v253_v17  ;;  %181 = vrsqrt.f32 %v102_v31 }
  0xae   :  { %144 = vst.msk [vmem:[%s408_s1 + $0x38] sm:$0xff] %vm40_vm0, %v128_v9  ;;  %183 = vrsqrt.f32 %v101_v32  ;;  %v88_v36 = vpop.xlane.xlu1 %87  ;;  %v85_v37 = vpop.xlane.xlu0 %84 }
  0xaf   :  { %v174_v38 = vpop.eup %173  ;;  %143 = vst.msk [vmem:[%s408_s1 + $0x30] sm:$0xff] %vm40_vm0, %v127_v33  ;;  %v104_v39 = vmax.f32 %v88_v36, 1e-24  ;;  %v103_v42 = vmax.f32 %v85_v37, 1e-24 }
  0xb0   :  { %v176_v16 = vpop.eup %175  ;;  %v130_v17 = vmul.f32 %v174_v38, %v264_v22 }
  0xb1   :  { %v129_v43 = vmul.f32 %v176_v16, %v269_v23  ;;  %185 = vrsqrt.f32 %v104_v39 }
  0xb2   :  { %146 = vst.msk [vmem:[%s408_s1 + $0x48] sm:$0xff] %vm40_vm0, %v130_v17  ;;  %187 = vrsqrt.f32 %v103_v42 }
  0xb3   :  { %v178_v44 = vpop.eup %177  ;;  %145 = vst.msk [vmem:[%s408_s1 + $0x40] sm:$0xff] %vm40_vm0, %v129_v43 }
  0xb4   :  { %v180_v45 = vpop.eup %179  ;;  %v132_v46 = vmul.f32 %v178_v44, %v280_v28 }
  0xb5   :  { %v131_v22 = vmul.f32 %v180_v45, %v285_v29 }
  0xb6   :  { %148 = vst.msk [vmem:[%s408_s1 + $0x58] sm:$0xff] %vm40_vm0, %v132_v46 }
  0xb7   :  { %v182_v23 = vpop.eup %181  ;;  %147 = vst.msk [vmem:[%s408_s1 + $0x50] sm:$0xff] %vm40_vm0, %v131_v22 }
  0xb8   :  { %v184_v47 = vpop.eup %183  ;;  %v134_v48 = vmul.f32 %v182_v23, %v296_v34 }
  0xb9   :  { %v133_v49 = vmul.f32 %v184_v47, %v301_v35 }
  0xba   :  { %150 = vst.msk [vmem:[%s408_s1 + $0x68] sm:$0xff] %vm40_vm0, %v134_v48 }
  0xbb   :  { %v186_v28 = vpop.eup %185  ;;  %149 = vst.msk [vmem:[%s408_s1 + $0x60] sm:$0xff] %vm40_vm0, %v133_v49 }
  0xbc   :  { %v188_v29 = vpop.eup %187  ;;  %v136_v50 = vmul.f32 %v186_v28, %v312_v40 }
  0xbd   :  { %v135_v51 = vmul.f32 %v188_v29, %v317_v41 }
  0xbe   :  { %152 = vst.msk [vmem:[%s408_s1 + $0x78] sm:$0xff] %vm40_vm0, %v136_v50 }
  0xbf   :  { %151 = vst.msk [vmem:[%s408_s1 + $0x70] sm:$0xff] %vm40_vm0, %v135_v51 }

</bundles_post_ra>
